<compile_context>
chip_gen: v7x
topology: tpu7x:2x2x1
jax: 0.10.0
libtpu: 0.0.40
codegen_flags: <defaults>
</compile_context>

<pallas_src>
import jax
import jax.numpy as jnp
from jax import lax
from jax.experimental import pallas as pl
from jax.experimental.pallas import tpu as pltpu

VMEM_LIMIT_BYTES = 48 * 1024 * 1024  # safe on v5e/v6e (128 MiB) and v7x (64 MiB)


def _round_up(x, m):
    return ((x + m - 1) // m) * m


# -------------------- row+col tiled matmul + bias (x-projection / FC) --------------------
def _matmul_bias_kernel(x_ref, w_ref, b_ref, o_ref):
    acc = jnp.dot(x_ref[...], w_ref[...], preferred_element_type=jnp.float32)
    o_ref[...] = (acc + b_ref[...].astype(jnp.float32)).astype(o_ref.dtype)


def matmul_bias(x, w, b, out_dtype, *, block_rows=512, block_cols=256):
    """y = x @ w + b.  x,w in bf16, f32 accumulation.  Tiled over rows and N cols.

    N (w.shape[1]) is always a multiple of 128 here (padded), so output stores
    are lane-dense.  Weights/bias blocks are indexed only by the N-tile, so they
    are not re-DMAed across row tiles.
    """
    M, K = x.shape
    N = w.shape[1]
    bm = min(block_rows, M)
    bn = block_cols if (N % block_cols == 0) else N
    grid = (pl.cdiv(M, bm), N // bn)
    return pl.pallas_call(
        _matmul_bias_kernel,
        out_shape=jax.ShapeDtypeStruct((M, N), out_dtype),
        grid_spec=pltpu.PrefetchScalarGridSpec(
            num_scalar_prefetch=0,
            grid=grid,
            in_specs=[
                pl.BlockSpec((bm, K), lambda i, j: (i, 0)),
                pl.BlockSpec((K, bn), lambda i, j: (0, j)),
                pl.BlockSpec((1, bn), lambda i, j: (0, j)),
            ],
            out_specs=pl.BlockSpec((bm, bn), lambda i, j: (i, j)),
        ),
        compiler_params=pltpu.CompilerParams(
            dimension_semantics=("parallel", "parallel"),
            vmem_limit_bytes=VMEM_LIMIT_BYTES,
        ),
    )(x, w, b)


# ----------------------------- LSTM recurrence kernel --------------------------------
def _lstm_recurrent_kernel(pg_ref, whh_ref, out_ref, h_scr, c_scr):
    # pg_ref:  (Tc, Bt, 4*Hp) bf16 -- precomputed x_t @ W_ih + (b_ih + b_hh)
    # whh_ref: (Hp, 4*Hp)     bf16 -- recurrent weight, VMEM-resident across grid
    # out_ref: (Tc, Bt, Hp)   bf16 -- hidden states for this time chunk
    # h_scr/c_scr: (Bt, Hp)   f32  -- recurrent state, persists across grid steps
    Hp = h_scr.shape[-1]
    Tc = pg_ref.shape[0]

    @pl.when(pl.program_id(1) == 0)
    def _():
        h_scr[...] = jnp.zeros_like(h_scr)
        c_scr[...] = jnp.zeros_like(c_scr)

    whh = whh_ref[...]  # hoisted: loaded once per time chunk

    def step(t, carry):
        gates = pg_ref[t].astype(jnp.float32) + jnp.dot(
            h_scr[...].astype(jnp.bfloat16), whh,
            preferred_element_type=jnp.float32,
        )  # (Bt, 4*Hp), f32 accumulation
        # Gate-blocked layout: each slice starts on a 128-lane boundary.
        i = jax.nn.sigmoid(gates[:, 0 * Hp:1 * Hp])
        f = jax.nn.sigmoid(gates[:, 1 * Hp:2 * Hp])
        g = jnp.tanh(gates[:, 2 * Hp:3 * Hp])
        o = jax.nn.sigmoid(gates[:, 3 * Hp:4 * Hp])
        c = f * c_scr[...] + i * g
        h = o * jnp.tanh(c)
        c_scr[...] = c
        h_scr[...] = h
        out_ref[t] = h.astype(out_ref.dtype)
        return carry

    lax.fori_loop(0, Tc, step, 0, unroll=True)


def lstm_recurrent(pre_gates, w_hh_t, *, block_batch=None, time_chunk=16):
    """Serial-in-time LSTM recurrence over precomputed (bf16) input pre-gates.

    pre_gates: (T, B, 4*Hp) time-major, gate-blocked columns.  Returns (T, B, Hp) bf16.
    Grid = (batch_shards, T // Tc): batch is 'parallel', time is 'arbitrary'
    (sequential; h/c carried in VMEM scratch, reset at the first chunk).
    """
    T, B, G = pre_gates.shape
    Hp = G // 4
    bt = B if block_batch is None else min(block_batch, B)
    nb = pl.cdiv(B, bt)
    # Largest divisor of T that is <= time_chunk (falls back to 1 for prime T).
    Tc = 1
    for d in range(1, min(time_chunk, T) + 1):
        if T % d == 0:
            Tc = d
    nt = T // Tc

    return pl.pallas_call(
        _lstm_recurrent_kernel,
        out_shape=jax.ShapeDtypeStruct((T, B, Hp), jnp.bfloat16),
        grid_spec=pltpu.PrefetchScalarGridSpec(
            num_scalar_prefetch=0,
            grid=(nb, nt),
            in_specs=[
                pl.BlockSpec((Tc, bt, G), lambda b, t: (t, b, 0)),
                pl.BlockSpec((Hp, G), lambda b, t: (0, 0)),  # resident, no re-DMA
            ],
            out_specs=pl.BlockSpec((Tc, bt, Hp), lambda b, t: (t, b, 0)),
            scratch_shapes=[
                pltpu.VMEM((bt, Hp), jnp.float32),  # h
                pltpu.VMEM((bt, Hp), jnp.float32),  # c
            ],
        ),
        compiler_params=pltpu.CompilerParams(
            dimension_semantics=("parallel", "arbitrary"),
            vmem_limit_bytes=VMEM_LIMIT_BYTES,
        ),
    )(pre_gates, w_hh_t)


# ----------------------------------- parameters ---------------------------------------
def init_params(key, input_size, hidden_size, num_layers, output_size):
    """PyTorch-style U(-1/sqrt(H), 1/sqrt(H)) init, then pad/pack for the kernels.

    Weights are stored transposed, lane-padded (H -> Hp, O -> Op, multiples of 128)
    and gate-blocked (i|f|g|o each in its own Hp-wide slab), in bf16.  Padded
    rows/columns are zero, which keeps padded h/c exactly 0 through the recurrence.
    """
    H = hidden_size
    Hp = _round_up(H, 128)
    Op = _round_up(output_size, 128)
    k = 1.0 / jnp.sqrt(jnp.float32(H))
    keys = jax.random.split(key, num_layers * 4 + 2)
    layers = []
    for l in range(num_layers):
        d_in = input_size if l == 0 else H
        d_in_pad = input_size if l == 0 else Hp
        k0, k1, k2, k3 = keys[4 * l:4 * l + 4]
        w_ih = jax.random.uniform(k0, (4 * H, d_in), jnp.float32, -k, k)
        w_hh = jax.random.uniform(k1, (4 * H, H), jnp.float32, -k, k)
        b_ih = jax.random.uniform(k2, (4 * H,), jnp.float32, -k, k)
        b_hh = jax.random.uniform(k3, (4 * H,), jnp.float32, -k, k)

        w_ih_t = jnp.zeros((d_in_pad, 4 * Hp), jnp.float32)
        w_hh_t = jnp.zeros((Hp, 4 * Hp), jnp.float32)
        bias = jnp.zeros((1, 4 * Hp), jnp.float32)
        for gi in range(4):  # PyTorch gate order: i, f, g, o
            w_ih_t = w_ih_t.at[:d_in, gi * Hp:gi * Hp + H].set(
                w_ih[gi * H:(gi + 1) * H, :].T)
            w_hh_t = w_hh_t.at[:H, gi * Hp:gi * Hp + H].set(
                w_hh[gi * H:(gi + 1) * H, :].T)
            bias = bias.at[0, gi * Hp:gi * Hp + H].set(
                b_ih[gi * H:(gi + 1) * H] + b_hh[gi * H:(gi + 1) * H])

        layers.append({
            "w_ih_t": w_ih_t.astype(jnp.bfloat16),   # (D_in_pad, 4*Hp)
            "w_hh_t": w_hh_t.astype(jnp.bfloat16),   # (Hp, 4*Hp)
            "b": bias,                                # (1, 4*Hp) f32
        })

    kf0, kf1 = keys[-2], keys[-1]
    fc_w = jax.random.uniform(kf0, (output_size, H), jnp.float32, -k, k)
    fc_b = jax.random.uniform(kf1, (output_size,), jnp.float32, -k, k)
    fc_w_t = jnp.zeros((Hp, Op), jnp.float32).at[:H, :output_size].set(fc_w.T)
    fc_b_p = jnp.zeros((1, Op), jnp.float32).at[0, :output_size].set(fc_b)

    return {
        "layers": layers,
        "fc_w_t": fc_w_t.astype(jnp.bfloat16),  # (Hp, Op)
        "fc_b": fc_b_p,                          # (1, Op) f32
        "hidden_size": H,
        "output_size": output_size,
    }


# ---------------------------------- model forward --------------------------------------
def lstm_model_forward(params, x_btd):
    # x_btd: (B, T, input_size) -- PyTorch batch_first convention
    B, T, D = x_btd.shape
    Bp = _round_up(B, 8)  # sublane-aligned batch

    x = jnp.transpose(x_btd, (1, 0, 2))  # time-major (T, B, D), done once
    if Bp != B:
        x = jnp.pad(x, ((0, 0), (0, Bp - B), (0, 0)))
    x = x.astype(jnp.bfloat16)

    for lp in params["layers"]:
        d_in = lp["w_ih_t"].shape[0]
        Hp = lp["w_hh_t"].shape[0]
        # (1) Hoisted input projection: one big pipelined bf16 MXU matmul over all
        #     timesteps; pre_gates emitted in bf16 (dominant HBM stream).
        pg = matmul_bias(x.reshape(T * Bp, d_in), lp["w_ih_t"], lp["b"],
                         out_dtype=jnp.bfloat16)          # (T*Bp, 4*Hp)
        pg = pg.reshape(T, Bp, 4 * Hp)
        # (2) Serial recurrence, time-chunked and pipelined over (batch, T//Tc).
        x = lstm_recurrent(pg, lp["w_hh_t"])               # (T, Bp, Hp) bf16

    # Dropout(p=0.2): identity in inference mode.
    Hp = x.shape[-1]
    y = matmul_bias(x.reshape(T * Bp, Hp), params["fc_w_t"], params["fc_b"],
                    out_dtype=jnp.float32)                  # (T*Bp, Op)
    Op = y.shape[-1]
    y = y.reshape(T, Bp, Op)[:, :B, :params["output_size"]]
    return jnp.transpose(y, (1, 0, 2))  # (B, T, O)


if __name__ == "__main__":
    # Small shapes consistent with the module
    batch, seq_len = 2, 8
    input_size, hidden_size, num_layers, output_size = 16, 32, 2, 4

    key = jax.random.PRNGKey(0)
    k_param, k_x = jax.random.split(key)
    params = init_params(k_param, input_size, hidden_size, num_layers, output_size)
    x = jax.random.normal(k_x, (batch, seq_len, input_size), jnp.float32)

    out = lstm_model_forward(params, x)
    jax.block_until_ready(out)
    assert out.shape == (batch, seq_len, output_size), out.shape
    assert bool(jnp.all(jnp.isfinite(out)))
    print("KERNEL_OK")
</pallas_src>

<mosaic_0001>
module attributes {stable_mosaic.version = 11 : i64} {
  func.func @_matmul_bias_kernel(%arg0: i32, %arg1: i32, %arg2: memref<64x16xbf16, #tpu.memory_space<vmem>>, %arg3: memref<16x256xbf16, #tpu.memory_space<vmem>>, %arg4: memref<1x256xf32, #tpu.memory_space<vmem>>, %arg5: memref<64x256xbf16, #tpu.memory_space<vmem>>) attributes {dimension_semantics = [#tpu.dimension_semantics<parallel>, #tpu.dimension_semantics<parallel>], iteration_bounds = array<i64: 1, 2>, scalar_prefetch = 0 : i64, scratch_operands = 0 : i64, tpu.core_type = #tpu.core_type<tc>, window_params = [{transform_indices = @transform_0, window_bounds = array<i64: 64, 16>}, {transform_indices = @transform_1, window_bounds = array<i64: 16, 256>}, {transform_indices = @transform_2, window_bounds = array<i64: 1, 256>}, {transform_indices = @transform_3, window_bounds = array<i64: 64, 256>}]} {
    %c0 = arith.constant 0 : index
    %c0_0 = arith.constant 0 : index
    %0 = vector.load %arg2[%c0, %c0_0] : memref<64x16xbf16, #tpu.memory_space<vmem>>, vector<64x16xbf16>
    %c0_1 = arith.constant 0 : index
    %c0_2 = arith.constant 0 : index
    %1 = vector.load %arg3[%c0_1, %c0_2] : memref<16x256xbf16, #tpu.memory_space<vmem>>, vector<16x256xbf16>
    %cst = arith.constant dense<0.000000e+00> : vector<64x256xf32>
    %2 = tpu.matmul %0, %1, %cst {dimension_numbers = #tpu.dot_dimension_numbers<[1], [0], [0], [1], [0, 0, 1, 1], [], []>} : vector<64x16xbf16>, vector<16x256xbf16>, vector<64x256xf32> -> vector<64x256xf32>
    %c0_3 = arith.constant 0 : index
    %c0_4 = arith.constant 0 : index
    %3 = vector.load %arg4[%c0_3, %c0_4] : memref<1x256xf32, #tpu.memory_space<vmem>>, vector<1x256xf32>
    %4 = vector.broadcast %3 : vector<1x256xf32> to vector<64x256xf32>
    %5 = arith.addf %2, %4 : vector<64x256xf32>
    %6 = arith.truncf %5 : vector<64x256xf32> to vector<64x256xbf16>
    %c0_5 = arith.constant 0 : index
    %c0_6 = arith.constant 0 : index
    %7 = vector.load %arg5[%c0_5, %c0_6] : memref<64x256xbf16, #tpu.memory_space<vmem>>, vector<64x256xbf16>
    tpu.vector_store %arg5[%c0_5, %c0_6], %6 {strides = array<i32>} : memref<64x256xbf16, #tpu.memory_space<vmem>>, vector<64x256xbf16>,
    return
  }
  func.func @transform_0(%arg0: i32, %arg1: i32) -> (i32, i32) {
    %c0_i32 = arith.constant 0 : i32
    %c0_i32_0 = arith.constant 0 : i32
    return %arg0, %c0_i32 : i32, i32
  }
  func.func @transform_1(%arg0: i32, %arg1: i32) -> (i32, i32) {
    %c0_i32 = arith.constant 0 : i32
    %c0_i32_0 = arith.constant 0 : i32
    return %c0_i32, %arg1 : i32, i32
  }
  func.func @transform_2(%arg0: i32, %arg1: i32) -> (i32, i32) {
    %c0_i32 = arith.constant 0 : i32
    %c0_i32_0 = arith.constant 0 : i32
    return %c0_i32, %arg1 : i32, i32
  }
  func.func @transform_3(%arg0: i32, %arg1: i32) -> (i32, i32) {
    %c0_i32 = arith.constant 0 : i32
    return %arg0, %arg1 : i32, i32
  }
}

</mosaic_0001>

<bundles_post_ra>
// kernel: tpu_custom_call.1
= control target key start
LH: loop header
LB: loop body
LE: loop exit
PB: predicated region body
PF: predicated region fallthrough
CT: control target
= control target key end

     0   :  { %8 = vsyncpa [#allocation4], 0  ;;  %s950_s0 = inlined_call_operand.vmem [shape: bf16[64,16], index: 0, kind: input, shape index: {}]   ;;  %s951_s1 = inlined_call_operand.vmem [shape: bf16[16,512], index: 1, kind: input, shape index: {}]   ;;  %s952_s2 = inlined_call_operand.vmem [shape: f32[1,512], index: 2, kind: input, shape index: {}]   ;;  %s953_s3 = inlined_call_operand.hbm [shape: bf16[64,512], index: 3, kind: output, shape index: {}]  }
   0x1   :  { %10 = vsyncpa [#allocation4 + $0x1], 0  ;;  %s799_s12 = smov 0   ;;  %s801_s13 = smov 0  }
   0x2   :  { %s803_s14 = smov 0   ;;  %s805_s15 = smov 0  }
   0x3   :  { %s807_s16 = smov 0   ;;  %s809_s17 = smov 0  }
   0x4 LB: > { %s581_s18 = sadd.s32 4294967295, %s772_s17   ;;  %s582_s19 = sadd.s32 4294967294, %s772_s17   ;;  %s772_s17 = sphi %s809_s17, %s16_s17   ;;  %s768_s16 = sphi %s807_s16, %s960_s16   ;;  %s764_s15 = sphi %s805_s15, %s959_s15   ;;  %s760_s14 = sphi %s803_s14, %s958_s14   ;;  %s756_s13 = sphi %s801_s13, %s957_s13   ;;  %s752_s12 = sphi %s799_s12, %s956_s12  }
   0x5   : > { %s25_s20 = sadd.s32 1, %s768_s16  ;;  %s61_s21 = sadd.s32 1, %s760_s14 }
   0x6   : > { %p26_p0 = scmp.ge.s32.totalorder %s25_s20, 2  ;;  %p68_p1 = scmp.ne.s32.totalorder %s760_s14, %s756_s13 }
   0x7   : > { %p69_p2 = scmp.eq.s32.totalorder %s772_s17, 0  ;;  %p126_p3 = scmp.eq.s32.totalorder %s581_s18, 1 }
   0x8   : > { %s962_s20 = smov (%p26_p0, %s25_s20), 0  ;;  %p131_p6 = scmp.ne.s32.totalorder %s756_s13, %s752_s12 }
   0x9   : > { %p70_p4 = por %p69_p2, %p68_p1  ;;  %p838_p5 = por %p126_p3, %p68_p1 }
   0xa   : > { %s58_s23 = ssub.s32 %s768_s16, %s962_s20  ;;  %p132_p8 = scmp.eq.s32.totalorder %s582_s19, 1 }
   0xb   : > { %p59_p7 = scmp.eq.s32.totalorder %s58_s23, 0  ;;  %p585_p10 = scmp.ge.s32.totalorder %s772_s17, 2 }
   0xc   : > { %p849_p9 = por %p132_p8, %p131_p6 }
   0xd   : > { %s847_s24 = scalar_select %p59_p7, %s760_s14, %s61_s21  }
   0xe   : > { %157 = sbr.rel (%p585_p10) target bundleno = 28 (0x1c), region = 20 }
  0x15   : > { %160 = sbr.rel (!%p70_p4) target bundleno = 28 (0x1c), region = 24  ;;  %s162_s26 = sand.u32 (%p70_p4), 1, %s760_s14  }
  0x16   : > { %s616_s27 = sshll.u32 (%p70_p4), %s768_s16, 3  ;;  %s586_s28 = sshll.u32 (%p70_p4), %s162_s26, 4 }
  0x17   : > { %s167_s4 = scalar_lea.vmem (%p70_p4), %s951_s1, %s616_s27  ;;  %s164_s5 = scalar_lea.vmem (%p70_p4), [#allocation2], %s586_s28 }
  0x18   : > { %v197_v0 = vld [vmem:[%s167_s4] sm:$0xff] (%p70_p4)  ;;  %v199_v1 = vld [vmem:[%s167_s4 + $0x10] sm:$0xff] (%p70_p4) }
  0x19   : > { %198 = vst [vmem:[%s164_s5] sm:$0xff] (%p70_p4), %v197_v0  ;;  %200 = vst [vmem:[%s164_s5 + $0x8] sm:$0xff] (%p70_p4), %v199_v1 }
  0x1c PF: > { %p589_p11 = scmp.ge.s32.totalorder %s772_s17, 1  ;;  %p213_p12 = scmp.lt.s32.totalorder %s772_s17, 3 }
  0x1e   : > { %p214_p13 = pnand %p589_p11, %p213_p12 }
  0x1f   : > { %s864_s6 = sand.u32 (!%p214_p13), 1, %s756_s13   ;;  %v774_v2 = vmov (!%p214_p13), 0   ;;  %v690_v4 = vld [vmem:[%s950_s0] sm:$0xff] (!%p214_p13)   ;;  %v691_v6 = vld [vmem:[%s950_s0 + $0x10] sm:$0xff] (!%p214_p13)   ;;  %vm319_vm0 = vcmask (!%p214_p13), 130048   ;;  %v692_v7 = vld [vmem:[%s950_s0 + $0x8] sm:$0xff] (!%p214_p13)   ;;  %v279_v9 = vlaneseq (!%p214_p13) }
  0x20   : > { %217 = sbr.rel (%p214_p13) target bundleno = 282 (0x11a), region = 66  ;;  %s590_s7 = sshll.u32 (!%p214_p13), %s864_s6, 4  ;;  %364 = vmatprep.mubr.bf16.mxu0 (!%p214_p13), %v774_v2  ;;  %384 = vmatprep.mubr.bf16.mxu1 (!%p214_p13), %v774_v2  ;;  %v693_v8 = vld [vmem:[%s950_s0 + $0x18] sm:$0xff] (!%p214_p13)  }
  0x21   : > { %s222_s8 = scalar_lea.vmem (!%p214_p13), [#allocation2], %s590_s7  ;;  %s592_s27 = sshll.u32 (!%p214_p13), %s764_s15, 1  ;;  %v280_v10 = vshrl.u32 (!%p214_p13), %v279_v9, 7 }
  0x22   : > { %v687_v3 = vld [vmem:[%s222_s8 + $0x4] ss:$8 sps:$4 sm:$0xff] (!%p214_p13)   ;;  %v689_v5 = vld [vmem:[%s222_s8] ss:$8 sps:$4 sm:$0xff] (!%p214_p13)   ;;  %p260_p0 = scmp.lt.s32.totalorder (!%p214_p13), %s592_s27, 3  ;;  %s591_s4 = sshll.u32 (!%p214_p13), %s864_s6, 6 }
  0x23   : > { %332 = vmatprep.subr.bf16.mxu0 (!%p214_p13), %v687_v3  ;;  %626 = vmatprep.subr.bf16.mxu1 (!%p214_p13), %v687_v3  ;;  %v281_v11 = vsub.s32 (!%p214_p13), 0, %v280_v10  ;;  %v285_v13 = vsub.s32 (!%p214_p13), 1, %v280_v10  ;;  %s884_s5 = scalar_lea.vmem (!%p214_p13), [#allocation3], %s591_s4  ;;  %s625_s8 = sshll.u32 (!%p214_p13), %s764_s15, 7 }
  0x24   : > { %333 = vmatpush1.bf16.msra.mxu0 (!%p214_p13), %v689_v5  ;;  %627 = vmatpush1.bf16.msra.mxu1 (!%p214_p13), %v689_v5  ;;  %s478_s7 = sshll.u32 (!%p214_p13), %s884_s5, 4  ;;  %s897_s11 = scalar_lea.hbm (!%p214_p13), %s953_s3, %s625_s8  ;;  %s892_s7 = int_to_ptr.vmem [resolvable:$true] %s478_s7 }
  0x25   : > { %s462_s15 = scalar_lea.sflag (!%p214_p13), [#allocation4], %s864_s6  ;;  %s694_s18 = scalar_lea.vmem (!%p214_p13), %s892_s7, 1024 }
  0x26   : > { %p695_p1 = scmp.ne.s32.totalorder (!%p214_p13), %s892_s7, %s694_s18  ;;  %s775_s19 = smov (!%p214_p13), [#allocation3]  }
  0x27   : > { %599 = vmatmul.mubr.msk.bf16.vlgmr.msra.gmra.mrb[0].mxu0 %vm319_vm0, %v690_v4  ;;  %601 = vmatmul.mubr.msk.bf16.vlgmr.msra.gmra.mrb[0].mxu1 %vm319_vm0, %v691_v6  ;;  %s964_s27 = smov (!%p260_p0, %s592_s27), 3  ;;  %s698_s21 = sshll.u32 %s775_s19, 4  ;;  %s699_s21 = int_to_ptr.vmem [resolvable:$false] %s698_s21 }
  0x28   : > { %374 = vmatprep.mubr.bf16.mxu0 %v774_v2  ;;  %394 = vmatprep.mubr.bf16.mxu1 %v774_v2  ;;  %s262_s30 = scalar_lea.vmem %s952_s2, %s964_s27  ;;  %p696_p2 = pnand %p695_p1, %p838_p5 }
  0x29   : > { %v277_v12 = vld [vmem:[%s262_s30] sm:$0x3]  ;;  %s700_s23 = scalar_lea.vmem %s699_s21, 2048  ;;  %p701_p4 = scmp.lt.s32.totalorder %s892_s7, %s699_s21 }
  0x2a   : > { %v282_v14 = vrot.slane %v277_v12, %v281_v11  ;;  %v286_v15 = vrot.slane %v277_v12, %v285_v13  ;;  %p697_p3 = pneg %p696_p2  ;;  %p702_p6 = scmp.lt.s32.totalorder %s700_s23, %s694_s18 }
  0x2c   : > { %p703_p7 = por %p702_p6, %p701_p4 }
  0x2e   : > { %p704_p8 = pnand %p703_p7, %p697_p3 }
  0x2f   : > { %600 = vmatmul.mubr.msk.bf16.gmra.mrb[4].mxu0 %vm319_vm0, %v692_v7  ;;  %602 = vmatmul.mubr.msk.bf16.gmra.mrb[4].mxu1 %vm319_vm0, %v693_v8 }
  0xfa   : > { %v366_v16 = vpop.f32.mrb[0].mxu0  ;;  %v386_v17 = vpop.f32.mrb[0].mxu1 }
  0xfb   : > { %v367_v18 = vadd.f32 %v366_v16, %v282_v14  ;;  %v387_v19 = vadd.f32 %v386_v17, %v282_v14  ;;  %v368_v20 = vpop.f32.mrb[1].mxu0  ;;  %v388_v21 = vpop.f32.mrb[1].mxu1 }
  0xfc   : > { %v369_v22 = vadd.f32 %v368_v20, %v286_v15  ;;  %v389_v23 = vadd.f32 %v388_v21, %v286_v15  ;;  %v370_v24 = vpop.f32.mrb[2].mxu0  ;;  %v390_v25 = vpop.f32.mrb[2].mxu1 }
  0xfd   : > { %v371_v26 = vadd.f32 %v370_v24, %v282_v14  ;;  %v391_v27 = vadd.f32 %v390_v25, %v282_v14  ;;  %v372_v28 = vpop.f32.mrb[3].mxu0  ;;  %v392_v29 = vpop.f32.mrb[3].mxu1 }
  0xfe   : > { %v617_v30 = vpack.c.bf16 %v369_v22, %v367_v18  ;;  %v621_v31 = vpack.c.bf16 %v389_v23, %v387_v19  ;;  %v373_v32 = vadd.f32 %v372_v28, %v286_v15  ;;  %v393_v33 = vadd.f32 %v392_v29, %v286_v15 }
 0x100   : > { %453 = vst [vmem:[%s884_s5] sm:$0xff] %v617_v30  ;;  %457 = vst [vmem:[%s884_s5 + $0x20] sm:$0xff] %v621_v31  ;;  %v618_v34 = vpack.c.bf16 %v373_v32, %v371_v26  ;;  %v622_v35 = vpack.c.bf16 %v393_v33, %v391_v27 }
 0x102   : > { %454 = vst [vmem:[%s884_s5 + $0x8] sm:$0xff] %v618_v34  ;;  %458 = vst [vmem:[%s884_s5 + $0x28] sm:$0xff] %v622_v35  ;;  %v376_v36 = vpop.f32.mrb[4].mxu0  ;;  %v396_v37 = vpop.f32.mrb[4].mxu1 }
 0x103   : > { %v377_v38 = vadd.f32 %v376_v36, %v282_v14  ;;  %v397_v39 = vadd.f32 %v396_v37, %v282_v14  ;;  %v378_v40 = vpop.f32.mrb[5].mxu0  ;;  %v398_v41 = vpop.f32.mrb[5].mxu1 }
 0x104   : > { %v379_v42 = vadd.f32 %v378_v40, %v286_v15  ;;  %v399_v43 = vadd.f32 %v398_v41, %v286_v15  ;;  %v380_v44 = vpop.f32.mrb[6].mxu0  ;;  %v400_v45 = vpop.f32.mrb[6].mxu1 }
 0x105   : > { %v381_v46 = vadd.f32 %v380_v44, %v282_v14  ;;  %v401_v47 = vadd.f32 %v400_v45, %v282_v14  ;;  %v382_v48 = vpop.f32.mrb[7].mxu0  ;;  %v402_v49 = vpop.f32.mrb[7].mxu1 }
 0x106   : > { %v619_v50 = vpack.c.bf16 %v379_v42, %v377_v38  ;;  %v623_v51 = vpack.c.bf16 %v399_v43, %v397_v39  ;;  %v383_v52 = vadd.f32 %v382_v48, %v286_v15  ;;  %v403_v53 = vadd.f32 %v402_v49, %v286_v15 }
 0x108   : > { %455 = vst [vmem:[%s884_s5 + $0x10] sm:$0xff] %v619_v50  ;;  %459 = vst [vmem:[%s884_s5 + $0x30] sm:$0xff] %v623_v51  ;;  %v620_v54 = vpack.c.bf16 %v383_v52, %v381_v46  ;;  %v624_v55 = vpack.c.bf16 %v403_v53, %v401_v47 }
 0x10a   : > { %456 = vst [vmem:[%s884_s5 + $0x18] sm:$0xff] %v620_v54  ;;  %460 = vst [vmem:[%s884_s5 + $0x38] sm:$0xff] %v624_v55 }
 0x10b   : > { %707 = shalt.err (!%p704_p8)
}
 0x10c   : > { %s708_s26 = scalar_lea.hbm %s897_s11, 1024  ;;  %s712_s29 = scalar_lea.hbm %s953_s3, 2048 }
 0x10d   : > { %p709_p11 = scmp.ne.s32.totalorder %s897_s11, %s708_s26  ;;  %p713_p0 = scmp.lt.u32.totalorder %s897_s11, %s953_s3 }
 0x10e   : > { %p714_p1 = scmp.lt.u32.totalorder %s712_s29, %s708_s26  ;;  %p716_p3 = scmp.lt.u32.totalorder %s708_s26, %s897_s11 }
 0x10f   : > { %p710_p12 = pnand %p709_p11, %p838_p5 }
 0x110   : > { %p715_p2 = por %p714_p1, %p713_p0 }
 0x111   : > { %p711_p13 = pneg %p710_p12 }
 0x112   : > { %p717_p4 = por %p716_p3, %p715_p2 }
 0x114   : > { %p718_p6 = pnand %p717_p4, %p711_p13 }
 0x116   : > { %721 = shalt.err (!%p718_p6)
}
 0x117   : > { %s776_s5 = smov 128   ;;  %s777_s8 = smov 256  }
 0x118   : > { %s778_s9 = smov 8  }
 0x119   : > { %628 = dma.vmem_to_hbm [thread:$0]  (%p838_p5), %s892_s7, 1024, %s897_s11, %s462_s15, %s776_s5, %s777_s8, %s778_s9  }
 0x11a PF: > { %s493_s10 = sand.u32 1, %s752_s12   ;;  %p631_p7 = pnand %p585_p10, %p849_p9 }
 0x11b   : > { %s494_s18 = scalar_lea.sflag [#allocation4], %s493_s10 }
 0x11c   : > { %747 = dma.done.wait (!%p631_p7), %s494_s18, 1024  }
 0x11d   : > { %749 = vsyncadd (!%p631_p7), %s494_s18, 4294966272  ;;  %s16_s17 = sadd.s32 1, %s772_s17   ;;  %s956_s12 = smov %s756_s13 }
 0x11e   : > { %p13_p8 = scmp.ge.s32.totalorder %s16_s17, 4   ;;  %s957_s13 = smov %s760_s14 }
 0x11f   : > { %s958_s14 = smov %s847_s24  ;;  %s959_s15 = smov %s768_s16 }
 0x120   : > { %s960_s16 = smov %s962_s20  ;;  %15 = sbr.rel (!%p13_p8) target bundleno = 4 (0x4), region = 116 }
 0x127   :  { %499 = vsyncpa [#allocation4], 1 }
 0x128   :  { %501 = vsyncpa [#allocation4 + $0x1], 1 }

</bundles_post_ra>
